<compile_context>
chip_gen: v7x
topology: tpu7x:2x2x1
jax: 0.10.0
libtpu: 0.0.40
codegen_flags: <defaults>
</compile_context>

<pallas_src>
import jax
import jax.numpy as jnp
from jax.experimental import pallas as pl
from jax.experimental.pallas import tpu as pltpu

IN_DIM = 28 * 28
H1, H2, H3 = 256, 128, 64
H3_PAD = 128   # lane-dense layer-3 width (extra cols are zeros)
OUT_DIM = 10
OUT_PAD = 128  # lane-dense output slab (sliced back to 10 in the wrapper)
GRANULE = 16   # sublane granule covering both f32 (8) and bf16 (16) tiles


def mlp_kernel(x_ref, w1_ref, b1_ref, w2_ref, b2_ref,
               w3_ref, b3_ref, w4_ref, b4_ref, o_ref):
    # Stream f32 activations from HBM; cast to bf16 on the VPU (free in a
    # mem-bound regime). All matmuls are bf16 MXU with f32 accumulation; the
    # bias add + ReLU stay in f32 before the bf16 repack (v5e has no bf16 VALU).
    x = x_ref[...].astype(jnp.bfloat16)
    # layer1: 784 -> 256, relu
    h = jnp.dot(x, w1_ref[...], preferred_element_type=jnp.float32)
    h = jnp.maximum(h + b1_ref[...], 0.0).astype(jnp.bfloat16)
    # layer2: 256 -> 128, relu
    h = jnp.dot(h, w2_ref[...], preferred_element_type=jnp.float32)
    h = jnp.maximum(h + b2_ref[...], 0.0).astype(jnp.bfloat16)
    # layer3: 128 -> 128 (64 real cols + 64 zero cols), relu
    h = jnp.dot(h, w3_ref[...], preferred_element_type=jnp.float32)
    h = jnp.maximum(h + b3_ref[...], 0.0).astype(jnp.bfloat16)
    # output: 128 -> 128 (10 real cols, zero-padded K rows/cols), no activation
    o = jnp.dot(h, w4_ref[...], preferred_element_type=jnp.float32)
    o_ref[...] = (o + b4_ref[...]).astype(o_ref.dtype)


def _round_up(x, m):
    return ((x + m - 1) // m) * m


def fashion_mnist_net(x_nchw, params, *, tile_b=1024):
    """Forward pass of FashionMNISTNet.

    x_nchw: (B, 1, 28, 28) float32 (PyTorch NCHW layout).
    params: output of prepare_params() — bf16 (in,out) weights, f32 (1,out)
            biases, layers 3/4 pre-padded to 128 lanes.
    Returns logits of shape (B, 10) in float32.
    """
    B = x_nchw.shape[0]
    x = x_nchw.reshape(B, IN_DIM)  # == torch x.view(-1, 784); stays f32

    # Round the batch only to the sublane granule (no-op for the usual
    # multiple-of-16 batch sizes); ragged final tiles handle the rest.
    b_pad = _round_up(B, GRANULE)
    if b_pad != B:
        x = jnp.pad(x, ((0, b_pad - B), (0, 0)))

    # Big batch tile to amortize per-grid-step overhead, but keep >= 2 grid
    # steps when there is enough work so v7x's two TensorCores both get tiles.
    tile_b = min(_round_up(tile_b, GRANULE), b_pad)
    if b_pad >= 2 * 128:
        tile_b = min(tile_b, _round_up(pl.cdiv(b_pad, 2), GRANULE))
    grid = (pl.cdiv(b_pad, tile_b),)

    args = (x, params["w1"], params["b1"], params["w2"], params["b2"],
            params["w3"], params["b3"], params["w4"], params["b4"])

    # Weights / biases: full-array blocks with constant index_maps, so the
    # pipeline DMAs them once and keeps them VMEM-resident across batch tiles.
    def resident(a):
        return pl.BlockSpec(a.shape, lambda i: (0, 0))

    flops = 2 * b_pad * (IN_DIM * H1 + H1 * H2 + H2 * H3_PAD + H3_PAD * OUT_PAD)
    weight_bytes = sum(int(a.size) * a.dtype.itemsize for a in args[1:])
    bytes_accessed = int(weight_bytes
                         + x.size * x.dtype.itemsize   # f32 activations in
                         + b_pad * OUT_PAD * 2)        # bf16 logits out

    out = pl.pallas_call(
        mlp_kernel,
        out_shape=jax.ShapeDtypeStruct((b_pad, OUT_PAD), jnp.bfloat16),
        grid=grid,
        in_specs=[pl.BlockSpec((tile_b, IN_DIM), lambda i: (i, 0))]
                 + [resident(a) for a in args[1:]],
        out_specs=pl.BlockSpec((tile_b, OUT_PAD), lambda i: (i, 0)),
        compiler_params=pltpu.CompilerParams(
            dimension_semantics=("parallel",)),
        cost_estimate=pl.CostEstimate(
            flops=flops, transcendentals=0, bytes_accessed=bytes_accessed),
    )(*args)

    return out[:B, :OUT_DIM].astype(jnp.float32)


def init_params(key):
    """Raw f32 params mimicking nn.Linear default (uniform +-1/sqrt(fan_in)),
    stored (in, out)."""
    dims = [(IN_DIM, H1), (H1, H2), (H2, H3), (H3, OUT_DIM)]
    params = {}
    keys = jax.random.split(key, 2 * len(dims))
    for idx, (fan_in, fan_out) in enumerate(dims):
        bound = 1.0 / (fan_in ** 0.5)
        params[f"w{idx + 1}"] = jax.random.uniform(
            keys[2 * idx], (fan_in, fan_out),
            minval=-bound, maxval=bound, dtype=jnp.float32)
        params[f"b{idx + 1}"] = jax.random.uniform(
            keys[2 * idx + 1], (1, fan_out),
            minval=-bound, maxval=bound, dtype=jnp.float32)
    return params


def prepare_params(params):
    """One-time packing for the kernel: bf16 weights, f32 biases, and
    zero-padding of layers 3/4 to lane-dense 128-wide shapes (hoisted out of
    the per-call wrapper)."""
    w3 = jnp.pad(params["w3"], ((0, 0), (0, H3_PAD - H3)))
    b3 = jnp.pad(params["b3"], ((0, 0), (0, H3_PAD - H3)))
    w4 = jnp.pad(params["w4"], ((0, H3_PAD - H3), (0, OUT_PAD - OUT_DIM)))
    b4 = jnp.pad(params["b4"], ((0, 0), (0, OUT_PAD - OUT_DIM)))
    return {
        "w1": params["w1"].astype(jnp.bfloat16),
        "b1": params["b1"].astype(jnp.float32),
        "w2": params["w2"].astype(jnp.bfloat16),
        "b2": params["b2"].astype(jnp.float32),
        "w3": w3.astype(jnp.bfloat16),
        "b3": b3.astype(jnp.float32),
        "w4": w4.astype(jnp.bfloat16),
        "b4": b4.astype(jnp.float32),
    }


def reference_forward(x_nchw, raw_params):
    """Pure-JAX reference mirroring the kernel's bf16/f32-accumulate numerics
    (padding with zeros is mathematically a no-op, so raw params are used)."""
    x = x_nchw.reshape(x_nchw.shape[0], IN_DIM).astype(jnp.bfloat16)

    def layer(h, w, b, relu=True):
        o = jnp.dot(h, w.astype(jnp.bfloat16),
                    preferred_element_type=jnp.float32) + b
        if relu:
            return jnp.maximum(o, 0.0).astype(jnp.bfloat16)
        return o

    h = layer(x, raw_params["w1"], raw_params["b1"])
    h = layer(h, raw_params["w2"], raw_params["b2"])
    h = layer(h, raw_params["w3"], raw_params["b3"])
    o = layer(h, raw_params["w4"], raw_params["b4"], relu=False)
    # Kernel stores the logit slab in bf16; mirror that rounding.
    return o.astype(jnp.bfloat16).astype(jnp.float32)


if __name__ == "__main__":
    key = jax.random.PRNGKey(0)
    k_params, k_x = jax.random.split(key)
    raw_params = init_params(k_params)
    params = prepare_params(raw_params)

    B = 8
    x = jax.random.normal(k_x, (B, 1, 28, 28), dtype=jnp.float32)

    out = fashion_mnist_net(x, params)
    out = jax.block_until_ready(out)

    ref = reference_forward(x, raw_params)
    assert out.shape == (B, OUT_DIM)
    assert jnp.allclose(out, ref, atol=1e-2, rtol=1e-2)
    print("KERNEL_OK")
</pallas_src>

<mosaic_0001>
module attributes {stable_mosaic.version = 11 : i64} {
  func.func @mlp_kernel(%arg0: i32, %arg1: memref<16x784xf32, #tpu.memory_space<vmem>>, %arg2: memref<784x256xbf16, #tpu.memory_space<vmem>>, %arg3: memref<1x256xf32, #tpu.memory_space<vmem>>, %arg4: memref<256x128xbf16, #tpu.memory_space<vmem>>, %arg5: memref<1x128xf32, #tpu.memory_space<vmem>>, %arg6: memref<128x128xbf16, #tpu.memory_space<vmem>>, %arg7: memref<1x128xf32, #tpu.memory_space<vmem>>, %arg8: memref<128x128xbf16, #tpu.memory_space<vmem>>, %arg9: memref<1x128xf32, #tpu.memory_space<vmem>>, %arg10: memref<16x128xbf16, #tpu.memory_space<vmem>>) attributes {dimension_semantics = [#tpu.dimension_semantics<parallel>], iteration_bounds = array<i64: 1>, scalar_prefetch = 0 : i64, scratch_operands = 0 : i64, tpu.core_type = #tpu.core_type<tc>, window_params = [{transform_indices = @transform_0, window_bounds = array<i64: 16, 784>}, {pipeline_mode = #tpu.pipeline_mode<synchronous>, transform_indices = @transform_1, window_bounds = array<i64: 784, 256>}, {pipeline_mode = #tpu.pipeline_mode<synchronous>, transform_indices = @transform_2, window_bounds = array<i64: 1, 256>}, {pipeline_mode = #tpu.pipeline_mode<synchronous>, transform_indices = @transform_3, window_bounds = array<i64: 256, 128>}, {pipeline_mode = #tpu.pipeline_mode<synchronous>, transform_indices = @transform_4, window_bounds = array<i64: 1, 128>}, {pipeline_mode = #tpu.pipeline_mode<synchronous>, transform_indices = @transform_5, window_bounds = array<i64: 128, 128>}, {pipeline_mode = #tpu.pipeline_mode<synchronous>, transform_indices = @transform_6, window_bounds = array<i64: 1, 128>}, {pipeline_mode = #tpu.pipeline_mode<synchronous>, transform_indices = @transform_7, window_bounds = array<i64: 128, 128>}, {pipeline_mode = #tpu.pipeline_mode<synchronous>, transform_indices = @transform_8, window_bounds = array<i64: 1, 128>}, {transform_indices = @transform_9, window_bounds = array<i64: 16, 128>}]} {
    %c0 = arith.constant 0 : index
    %c0_0 = arith.constant 0 : index
    %0 = vector.load %arg1[%c0, %c0_0] : memref<16x784xf32, #tpu.memory_space<vmem>>, vector<16x784xf32>
    %1 = arith.truncf %0 : vector<16x784xf32> to vector<16x784xbf16>
    %c0_1 = arith.constant 0 : index
    %c0_2 = arith.constant 0 : index
    %2 = vector.load %arg2[%c0_1, %c0_2] : memref<784x256xbf16, #tpu.memory_space<vmem>>, vector<784x256xbf16>
    %cst = arith.constant dense<0.000000e+00> : vector<16x256xf32>
    %3 = tpu.matmul %1, %2, %cst {dimension_numbers = #tpu.dot_dimension_numbers<[1], [0], [0], [1], [0, 0, 1, 1], [], []>} : vector<16x784xbf16>, vector<784x256xbf16>, vector<16x256xf32> -> vector<16x256xf32>
    %c0_3 = arith.constant 0 : index
    %c0_4 = arith.constant 0 : index
    %4 = vector.load %arg3[%c0_3, %c0_4] : memref<1x256xf32, #tpu.memory_space<vmem>>, vector<1x256xf32>
    %5 = vector.broadcast %4 : vector<1x256xf32> to vector<16x256xf32>
    %6 = arith.addf %3, %5 : vector<16x256xf32>
    %cst_5 = arith.constant 0.000000e+00 : f32
    %7 = vector.broadcast %cst_5 : f32 to vector<16x256xf32>
    %8 = arith.maximumf %6, %7 : vector<16x256xf32>
    %9 = arith.truncf %8 : vector<16x256xf32> to vector<16x256xbf16>
    %c0_6 = arith.constant 0 : index
    %c0_7 = arith.constant 0 : index
    %10 = vector.load %arg4[%c0_6, %c0_7] : memref<256x128xbf16, #tpu.memory_space<vmem>>, vector<256x128xbf16>
    %cst_8 = arith.constant dense<0.000000e+00> : vector<16x128xf32>
    %11 = tpu.matmul %9, %10, %cst_8 {dimension_numbers = #tpu.dot_dimension_numbers<[1], [0], [0], [1], [0, 0, 1, 1], [], []>} : vector<16x256xbf16>, vector<256x128xbf16>, vector<16x128xf32> -> vector<16x128xf32>
    %c0_9 = arith.constant 0 : index
    %c0_10 = arith.constant 0 : index
    %12 = vector.load %arg5[%c0_9, %c0_10] : memref<1x128xf32, #tpu.memory_space<vmem>>, vector<1x128xf32>
    %13 = vector.broadcast %12 : vector<1x128xf32> to vector<16x128xf32>
    %14 = arith.addf %11, %13 : vector<16x128xf32>
    %cst_11 = arith.constant 0.000000e+00 : f32
    %15 = vector.broadcast %cst_11 : f32 to vector<16x128xf32>
    %16 = arith.maximumf %14, %15 : vector<16x128xf32>
    %17 = arith.truncf %16 : vector<16x128xf32> to vector<16x128xbf16>
    %c0_12 = arith.constant 0 : index
    %c0_13 = arith.constant 0 : index
    %18 = vector.load %arg6[%c0_12, %c0_13] : memref<128x128xbf16, #tpu.memory_space<vmem>>, vector<128x128xbf16>
    %cst_14 = arith.constant dense<0.000000e+00> : vector<16x128xf32>
    %19 = tpu.matmul %17, %18, %cst_14 {dimension_numbers = #tpu.dot_dimension_numbers<[1], [0], [0], [1], [0, 0, 1, 1], [], []>} : vector<16x128xbf16>, vector<128x128xbf16>, vector<16x128xf32> -> vector<16x128xf32>
    %c0_15 = arith.constant 0 : index
    %c0_16 = arith.constant 0 : index
    %20 = vector.load %arg7[%c0_15, %c0_16] : memref<1x128xf32, #tpu.memory_space<vmem>>, vector<1x128xf32>
    %21 = vector.broadcast %20 : vector<1x128xf32> to vector<16x128xf32>
    %22 = arith.addf %19, %21 : vector<16x128xf32>
    %cst_17 = arith.constant 0.000000e+00 : f32
    %23 = vector.broadcast %cst_17 : f32 to vector<16x128xf32>
    %24 = arith.maximumf %22, %23 : vector<16x128xf32>
    %25 = arith.truncf %24 : vector<16x128xf32> to vector<16x128xbf16>
    %c0_18 = arith.constant 0 : index
    %c0_19 = arith.constant 0 : index
    %26 = vector.load %arg8[%c0_18, %c0_19] : memref<128x128xbf16, #tpu.memory_space<vmem>>, vector<128x128xbf16>
    %cst_20 = arith.constant dense<0.000000e+00> : vector<16x128xf32>
    %27 = tpu.matmul %25, %26, %cst_20 {dimension_numbers = #tpu.dot_dimension_numbers<[1], [0], [0], [1], [0, 0, 1, 1], [], []>} : vector<16x128xbf16>, vector<128x128xbf16>, vector<16x128xf32> -> vector<16x128xf32>
    %c0_21 = arith.constant 0 : index
    %c0_22 = arith.constant 0 : index
    %28 = vector.load %arg9[%c0_21, %c0_22] : memref<1x128xf32, #tpu.memory_space<vmem>>, vector<1x128xf32>
    %29 = vector.broadcast %28 : vector<1x128xf32> to vector<16x128xf32>
    %30 = arith.addf %27, %29 : vector<16x128xf32>
    %31 = arith.truncf %30 : vector<16x128xf32> to vector<16x128xbf16>
    %c0_23 = arith.constant 0 : index
    %c0_24 = arith.constant 0 : index
    %32 = vector.load %arg10[%c0_23, %c0_24] : memref<16x128xbf16, #tpu.memory_space<vmem>>, vector<16x128xbf16>
    tpu.vector_store %arg10[%c0_23, %c0_24], %31 {strides = array<i32>} : memref<16x128xbf16, #tpu.memory_space<vmem>>, vector<16x128xbf16>,
    return
  }
  func.func @transform_0(%arg0: i32) -> (i32, i32) {
    %c0_i32 = arith.constant 0 : i32
    %c0_i32_0 = arith.constant 0 : i32
    return %arg0, %c0_i32 : i32, i32
  }
  func.func @transform_1(%arg0: i32) -> (i32, i32) {
    %c0_i32 = arith.constant 0 : i32
    %c0_i32_0 = arith.constant 0 : i32
    %c0_i32_1 = arith.constant 0 : i32
    return %c0_i32, %c0_i32_0 : i32, i32
  }
  func.func @transform_2(%arg0: i32) -> (i32, i32) {
    %c0_i32 = arith.constant 0 : i32
    %c0_i32_0 = arith.constant 0 : i32
    %c0_i32_1 = arith.constant 0 : i32
    return %c0_i32, %c0_i32_0 : i32, i32
  }
  func.func @transform_3(%arg0: i32) -> (i32, i32) {
    %c0_i32 = arith.constant 0 : i32
    %c0_i32_0 = arith.constant 0 : i32
    %c0_i32_1 = arith.constant 0 : i32
    return %c0_i32, %c0_i32_0 : i32, i32
  }
  func.func @transform_4(%arg0: i32) -> (i32, i32) {
    %c0_i32 = arith.constant 0 : i32
    %c0_i32_0 = arith.constant 0 : i32
    %c0_i32_1 = arith.constant 0 : i32
    return %c0_i32, %c0_i32_0 : i32, i32
  }
  func.func @transform_5(%arg0: i32) -> (i32, i32) {
    %c0_i32 = arith.constant 0 : i32
    %c0_i32_0 = arith.constant 0 : i32
    %c0_i32_1 = arith.constant 0 : i32
    return %c0_i32, %c0_i32_0 : i32, i32
  }
  func.func @transform_6(%arg0: i32) -> (i32, i32) {
    %c0_i32 = arith.constant 0 : i32
    %c0_i32_0 = arith.constant 0 : i32
    %c0_i32_1 = arith.constant 0 : i32
    return %c0_i32, %c0_i32_0 : i32, i32
  }
  func.func @transform_7(%arg0: i32) -> (i32, i32) {
    %c0_i32 = arith.constant 0 : i32
    %c0_i32_0 = arith.constant 0 : i32
    %c0_i32_1 = arith.constant 0 : i32
    return %c0_i32, %c0_i32_0 : i32, i32
  }
  func.func @transform_8(%arg0: i32) -> (i32, i32) {
    %c0_i32 = arith.constant 0 : i32
    %c0_i32_0 = arith.constant 0 : i32
    %c0_i32_1 = arith.constant 0 : i32
    return %c0_i32, %c0_i32_0 : i32, i32
  }
  func.func @transform_9(%arg0: i32) -> (i32, i32) {
    %c0_i32 = arith.constant 0 : i32
    %c0_i32_0 = arith.constant 0 : i32
    return %arg0, %c0_i32 : i32, i32
  }
}

</mosaic_0001>

<bundles_post_ra>
// kernel: tpu_custom_call.1
= control target key start
LH: loop header
LB: loop body
LE: loop exit
PB: predicated region body
PF: predicated region fallthrough
CT: control target
= control target key end

     0   :  { %14 = vsyncpa [#allocation3], 0  ;;  %s2094_s0 = inlined_call_operand.hbm [shape: f32[16,784], index: 0, kind: input, shape index: {}]   ;;  %s2095_s1 = inlined_call_operand.hbm [shape: bf16[784,256], index: 1, kind: input, shape index: {}]   ;;  %s2096_s2 = inlined_call_operand.vmem [shape: f32[1,256], index: 2, kind: input, shape index: {}]   ;;  %s2097_s3 = inlined_call_operand.hbm [shape: bf16[256,128], index: 3, kind: input, shape index: {}]   ;;  %s2098_s4 = inlined_call_operand.vmem [shape: f32[1,128], index: 4, kind: input, shape index: {}]   ;;  %s2099_s5 = inlined_call_operand.hbm [shape: bf16[128,128], index: 5, kind: input, shape index: {}]   ;;  %s2100_s6 = inlined_call_operand.vmem [shape: f32[1,128], index: 6, kind: input, shape index: {}]   ;;  %s2101_s7 = inlined_call_operand.hbm [shape: bf16[128,128], index: 7, kind: input, shape index: {}]   ;;  %s2102_s8 = inlined_call_operand.vmem [shape: f32[1,128], index: 8, kind: input, shape index: {}]   ;;  %s2103_s9 = inlined_call_operand.hbm [shape: bf16[16,128], index: 9, kind: output, shape index: {}]  }
   0x1   :  { %15 = vsyncpa [#allocation6], 0 }
   0x2   :  { %16 = vsyncpa [#allocation9], 0 }
   0x3   :  { %17 = vsyncpa [#allocation4], 0  ;;  %s1913_s30 = smov [#allocation5]   ;;  %s1773_s13 = scalar_lea.hbm %s2095_s1, 12544 }
   0x4   :  { %s35_s10 = sshll.u32 %s1913_s30, 4  ;;  %p1774_p0 = scmp.ne.s32.totalorder %s2095_s1, %s1773_s13  ;;  %s36_s10 = int_to_ptr.vmem [resolvable:$true] %s35_s10 }
   0x5   :  { %p1777_p1 = scmp.lt.u32.totalorder %s1773_s13, %s2095_s1 }
   0x7   :  { %p1779_p2 = pnand %p1777_p1, %p1774_p0 }
   0x9   :  { %1782 = shalt.err (!%p1779_p2)
}
   0xa   :  { %s1783_s18 = scalar_lea.vmem %s36_s10, 12544  ;;  %p1788_p4 = scmp.lt.s32.totalorder %s36_s10, %s36_s10 }
   0xb   :  { %p1784_p3 = scmp.ne.s32.totalorder %s36_s10, %s1783_s18  ;;  %p1789_p5 = scmp.lt.s32.totalorder %s1783_s18, %s1783_s18 }
   0xd   :  { %p1790_p6 = por %p1789_p5, %p1788_p4 }
   0xf   :  { %p1791_p7 = pnand %p1790_p6, %p1784_p3 }
  0x11   :  { %1794 = shalt.err (!%p1791_p7)
}
  0x12   :  { %s1914_s19 = smov 128   ;;  %s1915_s20 = smov 8  }
  0x13   :  { %41 = dma.hbm_to_vmem [thread:$0]  %s2095_s1, 12544, %s36_s10, [#allocation6], %s1914_s19, %s1914_s19, %s1915_s20  }
  0x14   :  { %s1916_s23 = smov [#allocation8]   ;;  %s1917_s25 = smov [#allocation2]  }
  0x15   :  { %s63_s24 = sshll.u32 %s1916_s23, 4  ;;  %s23_s26 = sshll.u32 %s1917_s25, 4  ;;  %s64_s24 = int_to_ptr.vmem [resolvable:$true] %s63_s24  ;;  %s24_s26 = int_to_ptr.vmem [resolvable:$true] %s23_s26 }
  0x16   :  { %s1795_s29 = scalar_lea.hbm %s2099_s5, 1024 }
  0x17   :  { %p1796_p8 = scmp.ne.s32.totalorder %s2099_s5, %s1795_s29  ;;  %p1799_p9 = scmp.lt.u32.totalorder %s1795_s29, %s2099_s5 }
  0x19   :  { %p1801_p10 = pnand %p1799_p9, %p1796_p8 }
  0x1b   :  { %1804 = shalt.err (!%p1801_p10)
}
  0x1c   :  { %s1805_s1 = scalar_lea.vmem %s64_s24, 1024  ;;  %p1810_p12 = scmp.lt.s32.totalorder %s64_s24, %s64_s24 }
  0x1d   :  { %p1806_p11 = scmp.ne.s32.totalorder %s64_s24, %s1805_s1  ;;  %p1811_p13 = scmp.lt.s32.totalorder %s1805_s1, %s1805_s1 }
  0x1f   :  { %p1812_p0 = por %p1811_p13, %p1810_p12 }
  0x21   :  { %p1813_p1 = pnand %p1812_p0, %p1806_p11 }
  0x23   :  { %1816 = shalt.err (!%p1813_p1)
}
  0x24   :  { %s1918_s10 = smov 64   ;;  %s1919_s14 = smov 4  }
  0x25   :  { %69 = dma.hbm_to_vmem [thread:$0]  %s2099_s5, 1024, %s64_s24, [#allocation9], %s1918_s10, %s1918_s10, %s1919_s14  }
  0x26   :  { %s1817_s19 = scalar_lea.hbm %s2094_s0, 1792 }
  0x27   :  { %p1818_p2 = scmp.ne.s32.totalorder %s2094_s0, %s1817_s19  ;;  %p1821_p3 = scmp.lt.u32.totalorder %s1817_s19, %s2094_s0 }
  0x29   :  { %p1823_p4 = pnand %p1821_p3, %p1818_p2 }
  0x2b   :  { %1826 = shalt.err (!%p1823_p4)
}
  0x2c   :  { %s1827_s25 = scalar_lea.vmem %s24_s26, 1792  ;;  %p1832_p6 = scmp.lt.s32.totalorder %s24_s26, %s24_s26 }
  0x2d   :  { %p1828_p5 = scmp.ne.s32.totalorder %s24_s26, %s1827_s25  ;;  %p1833_p7 = scmp.lt.s32.totalorder %s1827_s25, %s1827_s25 }
  0x2f   :  { %p1834_p8 = por %p1833_p7, %p1832_p6 }
  0x31   :  { %p1835_p9 = pnand %p1834_p8, %p1828_p5 }
  0x33   :  { %1838 = shalt.err (!%p1835_p9)
}
  0x34   :  { %s1920_s5 = smov 896   ;;  %s1921_s24 = smov 56  }
  0x35   :  { %29 = dma.hbm_to_vmem [thread:$0]  %s2094_s0, 1792, %s24_s26, [#allocation3], %s1920_s5, %s1920_s5, %s1921_s24  }
  0x36   :  { %s1922_s29 = smov [#allocation7]   ;;  %s1923_s11 = smov [#allocation10]  }
  0x37   :  { %s49_s30 = sshll.u32 %s1922_s29, 4  ;;  %s77_s12 = sshll.u32 %s1923_s11, 4  ;;  %s50_s30 = int_to_ptr.vmem [resolvable:$true] %s49_s30  ;;  %s78_s12 = int_to_ptr.vmem [resolvable:$true] %s77_s12 }
  0x38   :  { %s1839_s15 = scalar_lea.hbm %s2097_s3, 2048 }
  0x39   :  { %p1840_p10 = scmp.ne.s32.totalorder %s2097_s3, %s1839_s15  ;;  %p1843_p11 = scmp.lt.u32.totalorder %s1839_s15, %s2097_s3 }
  0x3b   :  { %p1845_p12 = pnand %p1843_p11, %p1840_p10 }
  0x3d   :  { %1848 = shalt.err (!%p1845_p12)
}
  0x3e   :  { %s1849_s0 = scalar_lea.vmem %s50_s30, 2048  ;;  %p1854_p0 = scmp.lt.s32.totalorder %s50_s30, %s50_s30 }
  0x3f   :  { %p1850_p13 = scmp.ne.s32.totalorder %s50_s30, %s1849_s0  ;;  %p1855_p1 = scmp.lt.s32.totalorder %s1849_s0, %s1849_s0 }
  0x41   :  { %p1856_p2 = por %p1855_p1, %p1854_p0 }
  0x43   :  { %p1857_p3 = pnand %p1856_p2, %p1850_p13 }
  0x45   :  { %1860 = shalt.err (!%p1857_p3)
}
  0x46   :  { %55 = dma.hbm_to_vmem [thread:$0]  %s2097_s3, 2048, %s50_s30, [#allocation6], %s1918_s10, %s1918_s10, %s1919_s14  }
  0x47   :  { %s1861_s23 = scalar_lea.hbm %s2101_s7, 1024 }
  0x48   :  { %p1862_p4 = scmp.ne.s32.totalorder %s2101_s7, %s1861_s23  ;;  %p1865_p5 = scmp.lt.u32.totalorder %s1861_s23, %s2101_s7 }
  0x4a   :  { %p1867_p6 = pnand %p1865_p5, %p1862_p4 }
  0x4c   :  { %1870 = shalt.err (!%p1867_p6)
}
  0x4d   :  { %s1871_s28 = scalar_lea.vmem %s78_s12, 1024  ;;  %p1876_p8 = scmp.lt.s32.totalorder %s78_s12, %s78_s12 }
  0x4e   :  { %p1872_p7 = scmp.ne.s32.totalorder %s78_s12, %s1871_s28  ;;  %p1877_p9 = scmp.lt.s32.totalorder %s1871_s28, %s1871_s28 }
  0x50   :  { %p1878_p10 = por %p1877_p9, %p1876_p8 }
  0x52   :  { %p1879_p11 = pnand %p1878_p10, %p1872_p7 }
  0x54   :  { %1882 = shalt.err (!%p1879_p11)
}
  0x55   :  { %83 = dma.hbm_to_vmem [thread:$0]  %s2101_s7, 1024, %s78_s12, [#allocation9], %s1918_s10, %s1918_s10, %s1919_s14  }
  0x56   :  { %1905 = dma.done.wait [#allocation3], 1792  }
  0x57   :  { %1906 = vsyncadd [#allocation3], 4294965504 }
  0x58   :  { %1907 = dma.done.wait [#allocation6], 14592  }
  0x59   :  { %1908 = vsyncadd [#allocation6], 4294952704 }
  0x5a   :  { %1909 = dma.done.wait [#allocation9], 2048  }
  0x5b   :  { %1910 = vsyncadd [#allocation9], 4294965248  ;;  %v1594_v0 = vld [vmem:[#allocation5 + $0x104] ss:$8 sps:$4 sm:$0xff]   ;;  %v1596_v1 = vld [vmem:[#allocation5 + $0x100] ss:$8 sps:$4 sm:$0xff]  }
  0x5c   :  { %770 = vmatprep.subr.bf16.mxu0 %v1594_v0  ;;  %v1597_v2 = vld [vmem:[#allocation5 + $0x114] ss:$8 sps:$4 sm:$0xff]   ;;  %v1599_v3 = vld [vmem:[#allocation5 + $0x110] ss:$8 sps:$4 sm:$0xff]   ;;  %v1600_v4 = vld [vmem:[#allocation5 + $0x124] ss:$8 sps:$4 sm:$0xff]  }
  0x5d   :  { %771 = vmatpush1.bf16.msra.mxu0 %v1596_v1  ;;  %v1602_v5 = vld [vmem:[#allocation5 + $0x120] ss:$8 sps:$4 sm:$0xff]   ;;  %v1603_v6 = vld [vmem:[#allocation5 + $0x134] ss:$8 sps:$4 sm:$0xff]   ;;  %v1605_v7 = vld [vmem:[#allocation5 + $0x130] ss:$8 sps:$4 sm:$0xff]  }
  0x5e   :  { %772 = vmatprep.subr.bf16.mxu0 %v1597_v2  ;;  %v1606_v8 = vld [vmem:[#allocation5 + $0x144] ss:$8 sps:$4 sm:$0xff]   ;;  %v1608_v9 = vld [vmem:[#allocation5 + $0x140] ss:$8 sps:$4 sm:$0xff]   ;;  %v1609_v10 = vld [vmem:[#allocation5 + $0x154] ss:$8 sps:$4 sm:$0xff]  }
  0x5f   :  { %v1611_v11 = vld [vmem:[#allocation5 + $0x150] ss:$8 sps:$4 sm:$0xff]   ;;  %v1612_v12 = vld [vmem:[#allocation5 + $0x164] ss:$8 sps:$4 sm:$0xff]   ;;  %v1614_v16 = vld [vmem:[#allocation5 + $0x160] ss:$8 sps:$4 sm:$0xff]  }
  0x60   :  { %v105_v13 = vld [vmem:[#allocation2 + $0x18] sm:$0xff]  ;;  %v112_v14 = vld [vmem:[#allocation2 + $0x50] sm:$0xff]  ;;  %v1615_v17 = vld [vmem:[#allocation5 + $0x174] ss:$8 sps:$4 sm:$0xff]   ;;  %vm723_vm0 = vcmask 130048   ;;  %vm1926_vm1 = vmmov 0  }
  0x61   :  { %773 = vmatpush1.bf16.msra.mxu0 %v1599_v3  ;;  %v119_v15 = vpack.c.bf16 %v112_v14, %v105_v13  ;;  %v1648_v18 = vld [vmem:[#allocation5 + $0x4] ss:$8 sps:$4 sm:$0xff]   ;;  %v1617_v19 = vld [vmem:[#allocation5 + $0x170] ss:$8 sps:$4 sm:$0xff]   ;;  %v1653_v21 = vld [vmem:[#allocation5] ss:$8 sps:$4 sm:$0xff]  }
  0x62   :  { %774 = vmatprep.subr.bf16.mxu0 %v1600_v4  ;;  %v1618_v20 = vld [vmem:[#allocation5 + $0x184] ss:$8 sps:$4 sm:$0xff]   ;;  %727 = vmatprep.subr.bf16.mxu1 %v1648_v18  ;;  %v1654_v22 = vld [vmem:[#allocation5 + $0x14] ss:$8 sps:$4 sm:$0xff]   ;;  %v1620_v23 = vld [vmem:[#allocation5 + $0x180] ss:$8 sps:$4 sm:$0xff]  }
  0x63   :  { %802 = vmatprep.mubr.bf16.mxu0 %v119_v15  ;;  %728 = vmatpush1.bf16.msra.mxu1 %v1653_v21  ;;  %v1659_v24 = vld [vmem:[#allocation5 + $0x10] ss:$8 sps:$4 sm:$0xff]   ;;  %v1660_v25 = vld [vmem:[#allocation5 + $0x24] ss:$8 sps:$4 sm:$0xff]   ;;  %v1621_v26 = vld [vmem:[#allocation5 + $0x194] ss:$8 sps:$4 sm:$0xff]  }
  0x64   :  { %729 = vmatprep.subr.bf16.mxu1 %v1654_v22  ;;  %v1665_v27 = vld [vmem:[#allocation5 + $0x20] ss:$8 sps:$4 sm:$0xff]   ;;  %v1666_v28 = vld [vmem:[#allocation5 + $0x34] ss:$8 sps:$4 sm:$0xff]   ;;  %v1623_v29 = vld [vmem:[#allocation5 + $0x190] ss:$8 sps:$4 sm:$0xff]  }
  0x65   :  { %775 = vmatpush1.bf16.msra.mxu0 %v1602_v5  ;;  %v1624_v30 = vld [vmem:[#allocation5 + $0x1a4] ss:$8 sps:$4 sm:$0xff]   ;;  %v1671_v31 = vld [vmem:[#allocation5 + $0x30] ss:$8 sps:$4 sm:$0xff]   ;;  %v1626_v33 = vld [vmem:[#allocation5 + $0x1a0] ss:$8 sps:$4 sm:$0xff]  }
  0x66   :  { %776 = vmatprep.subr.bf16.mxu0 %v1603_v6  ;;  %v1672_v32 = vld [vmem:[#allocation5 + $0x44] ss:$8 sps:$4 sm:$0xff]   ;;  %v1627_v34 = vld [vmem:[#allocation5 + $0x1b4] ss:$8 sps:$4 sm:$0xff]   ;;  %v1677_v35 = vld [vmem:[#allocation5 + $0x40] ss:$8 sps:$4 sm:$0xff]  }
  0x67   :  { %730 = vmatpush1.bf16.msra.mxu1 %v1659_v24  ;;  %v1678_v36 = vld [vmem:[#allocation5 + $0x54] ss:$8 sps:$4 sm:$0xff]   ;;  %v1629_v37 = vld [vmem:[#allocation5 + $0x1b0] ss:$8 sps:$4 sm:$0xff]   ;;  %v1630_v38 = vld [vmem:[#allocation5 + $0x1c4] ss:$8 sps:$4 sm:$0xff]  }
  0x68   :  { %731 = vmatprep.subr.bf16.mxu1 %v1660_v25  ;;  %v1683_v39 = vld [vmem:[#allocation5 + $0x50] ss:$8 sps:$4 sm:$0xff]   ;;  %v1684_v40 = vld [vmem:[#allocation5 + $0x64] ss:$8 sps:$4 sm:$0xff]   ;;  %v1632_v41 = vld [vmem:[#allocation5 + $0x1c0] ss:$8 sps:$4 sm:$0xff]  }
  0x69   :  { %777 = vmatpush1.bf16.msra.mxu0 %v1605_v7  ;;  %v1633_v42 = vld [vmem:[#allocation5 + $0x1d4] ss:$8 sps:$4 sm:$0xff]   ;;  %v1689_v43 = vld [vmem:[#allocation5 + $0x60] ss:$8 sps:$4 sm:$0xff]   ;;  %v1635_v45 = vld [vmem:[#allocation5 + $0x1d0] ss:$8 sps:$4 sm:$0xff]  }
  0x6a   :  { %778 = vmatprep.subr.bf16.mxu0 %v1606_v8  ;;  %v1690_v44 = vld [vmem:[#allocation5 + $0x74] ss:$8 sps:$4 sm:$0xff]   ;;  %v1636_v46 = vld [vmem:[#allocation5 + $0x1e4] ss:$8 sps:$4 sm:$0xff]   ;;  %v1695_v47 = vld [vmem:[#allocation5 + $0x70] ss:$8 sps:$4 sm:$0xff]  }
  0x6b   :  { %732 = vmatpush1.bf16.msra.mxu1 %v1665_v27  ;;  %v1696_v48 = vld [vmem:[#allocation5 + $0x84] ss:$8 sps:$4 sm:$0xff]   ;;  %v1638_v49 = vld [vmem:[#allocation5 + $0x1e0] ss:$8 sps:$4 sm:$0xff]   ;;  %v1639_v50 = vld [vmem:[#allocation5 + $0x1f4] ss:$8 sps:$4 sm:$0xff]  }
  0x6c   :  { %733 = vmatprep.subr.bf16.mxu1 %v1666_v28  ;;  %v1701_v51 = vld [vmem:[#allocation5 + $0x80] ss:$8 sps:$4 sm:$0xff]   ;;  %v1702_v52 = vld [vmem:[#allocation5 + $0x94] ss:$8 sps:$4 sm:$0xff]   ;;  %v1641_v53 = vld [vmem:[#allocation5 + $0x1f0] ss:$8 sps:$4 sm:$0xff]  }
  0x6d   :  { %779 = vmatpush1.bf16.msra.mxu0 %v1608_v9  ;;  %v104_v54 = vld [vmem:[#allocation2 + $0x10] sm:$0xff]  ;;  %v111_v55 = vld [vmem:[#allocation2 + $0x48] sm:$0xff]  ;;  %v114_v62 = vld [vmem:[#allocation2 + $0x60] sm:$0xff]  ;;  %s1927_s15 = smov [#allocation11]  }
  0x6e   :  { %780 = vmatprep.subr.bf16.mxu0 %v1609_v10  ;;  %v1644_v56 = vld [vmem:[#allocation5 + $0x204] ss:$8 sps:$4 sm:$0xff]   ;;  %v1707_v57 = vld [vmem:[#allocation5 + $0x90] ss:$8 sps:$4 sm:$0xff]   ;;  %v1642_v58 = vld [vmem:[#allocation5 + $0x200] ss:$8 sps:$4 sm:$0xff]   ;;  %v118_v59 = vpack.c.bf16 %v111_v55, %v104_v54 }
  0x6f   :  { %734 = vmatpush1.bf16.msra.mxu1 %v1671_v31  ;;  %v1708_v60 = vld [vmem:[#allocation5 + $0xa4] ss:$8 sps:$4 sm:$0xff]   ;;  %v107_v61 = vld [vmem:[#allocation2 + $0x28] sm:$0xff]  ;;  %v1713_v1 = vld [vmem:[#allocation5 + $0xa0] ss:$8 sps:$4 sm:$0xff]   ;;  %s1326_s16 = sshll.u32 %s1927_s15, 4  ;;  %s1327_s16 = int_to_ptr.vmem [resolvable:$true] %s1326_s16 }
  0x70   :  { %735 = vmatprep.subr.bf16.mxu1 %v1672_v32  ;;  %v1647_v63 = vld [vmem:[#allocation5 + $0x214] ss:$8 sps:$4 sm:$0xff]   ;;  %v121_v0 = vpack.c.bf16 %v114_v62, %v107_v61  ;;  %v1645_v3 = vld [vmem:[#allocation5 + $0x210] ss:$8 sps:$4 sm:$0xff]   ;;  %v1652_v4 = vld [vmem:[#allocation5 + $0x224] ss:$8 sps:$4 sm:$0xff]   ;;  %p1888_p13 = scmp.lt.s32.totalorder %s1327_s16, %s1327_s16 }
  0x71   :  { %781 = vmatpush1.bf16.msra.mxu0 %v1611_v11  ;;  %v1714_v2 = vld [vmem:[#allocation5 + $0xb4] ss:$8 sps:$4 sm:$0xff]   ;;  %v1719_v7 = vld [vmem:[#allocation5 + $0xb0] ss:$8 sps:$4 sm:$0xff]   ;;  %v1720_v9 = vld [vmem:[#allocation5 + $0xc4] ss:$8 sps:$4 sm:$0xff]  }
  0x72   :  { %782 = vmatprep.subr.bf16.mxu0 %v1612_v12  ;;  %v103_v5 = vld [vmem:[#allocation2 + $0x8] sm:$0xff]  ;;  %v110_v6 = vld [vmem:[#allocation2 + $0x40] sm:$0xff]  ;;  %v1650_v10 = vld [vmem:[#allocation5 + $0x220] ss:$8 sps:$4 sm:$0xff]   ;;  %v1924_v61 = vmov 0  }
  0x73   :  { %736 = vmatpush1.bf16.msra.mxu1 %v1677_v35  ;;  %v117_v8 = vpack.c.bf16 %v110_v6, %v103_v5  ;;  %v1658_v11 = vld [vmem:[#allocation5 + $0x234] ss:$8 sps:$4 sm:$0xff]   ;;  %v1725_v12 = vld [vmem:[#allocation5 + $0xc0] ss:$8 sps:$4 sm:$0xff]   ;;  %v1656_v14 = vld [vmem:[#allocation5 + $0x230] ss:$8 sps:$4 sm:$0xff]  }
  0x74   :  { %737 = vmatprep.subr.bf16.mxu1 %v1678_v36  ;;  %v1726_v13 = vld [vmem:[#allocation5 + $0xd4] ss:$8 sps:$4 sm:$0xff]   ;;  %v1664_v15 = vld [vmem:[#allocation5 + $0x244] ss:$8 sps:$4 sm:$0xff]   ;;  %v1668_v22 = vld [vmem:[#allocation5 + $0x250] ss:$8 sps:$4 sm:$0xff]  }
  0x75   :  { %783 = vmatpush1.bf16.msra.mxu0 %v1614_v16  ;;  %759 = vmatprep.mubr.bf16.mxu1 %v117_v8  ;;  %v1662_v16 = vld [vmem:[#allocation5 + $0x240] ss:$8 sps:$4 sm:$0xff]   ;;  %v1670_v18 = vld [vmem:[#allocation5 + $0x254] ss:$8 sps:$4 sm:$0xff]   ;;  %v1740_v24 = vld [vmem:[#allocation5 + $0xf0] ss:$8 sps:$4 sm:$0xff]  }
  0x76   :  { %784 = vmatprep.subr.bf16.mxu0 %v1615_v17  ;;  %v1731_v17 = vld [vmem:[#allocation5 + $0xd0] ss:$8 sps:$4 sm:$0xff]   ;;  %v1738_v21 = vld [vmem:[#allocation5 + $0xf4] ss:$8 sps:$4 sm:$0xff]   ;;  %v1674_v28 = vld [vmem:[#allocation5 + $0x260] ss:$8 sps:$4 sm:$0xff]  }
  0x77   :  { %738 = vmatpush1.bf16.msra.mxu1 %v1683_v39  ;;  %v102_v25 = vld [vmem:[#allocation2] sm:$0xff]  ;;  %v1743_v32 = vld [vmem:[#allocation7 + $0x48] sm:$0xff]   ;;  %v1745_v36 = vld [vmem:[#allocation7 + $0x50] sm:$0xff]   ;;  %v1925_v8 = vmov 0.0  }
  0x78   :  { %739 = vmatprep.subr.bf16.mxu1 %v1684_v40  ;;  %v1741_v27 = vld [vmem:[#allocation7 + $0x40] sm:$0xff]   ;;  %v1744_v35 = vld [vmem:[#allocation7 + $0x8] sm:$0xff]   ;;  %v1746_v39 = vld [vmem:[#allocation7 + $0x10] sm:$0xff]  }
  0x79   :  { %785 = vmatpush1.bf16.msra.mxu0 %v1617_v19  ;;  %v1732_v19 = vld [vmem:[#allocation5 + $0xe4] ss:$8 sps:$4 sm:$0xff]   ;;  %v1730_v54 = vld [vmem:[#allocation5 + $0x2f4] ss:$8 sps:$4 sm:$0xff]   ;;  %v1728_v55 = vld [vmem:[#allocation5 + $0x2f0] ss:$8 sps:$4 sm:$0xff]  }
  0x7a   :  { %786 = vmatprep.subr.bf16.mxu0 %v1618_v20  ;;  %v1737_v20 = vld [vmem:[#allocation5 + $0xe0] ss:$8 sps:$4 sm:$0xff]  }
  0x7b   :  { %740 = vmatpush1.bf16.msra.mxu1 %v1689_v43  ;;  %v1747_v40 = vld [vmem:[#allocation7 + $0x58] sm:$0xff]   ;;  %v108_v62 = vld [vmem:[#allocation2 + $0x30] sm:$0xff] }
  0x7c   :  { %741 = vmatprep.subr.bf16.mxu1 %v1690_v44  ;;  %v1748_v43 = vld [vmem:[#allocation7 + $0x18] sm:$0xff]   ;;  %v1749_v44 = vld [vmem:[#allocation7 + $0x60] sm:$0xff]   ;;  %v1754_v5 = vld [vmem:[#allocation7 + $0x30] sm:$0xff]  }
  0x7d   :  { %787 = vmatpush1.bf16.msra.mxu0 %v1620_v23  ;;  %v1676_v23 = vld [vmem:[#allocation5 + $0x264] ss:$8 sps:$4 sm:$0xff]  }
  0x7e   :  { %788 = vmatprep.subr.bf16.mxu0 %v1621_v26  ;;  %v109_v26 = vld [vmem:[#allocation2 + $0x38] sm:$0xff] }
  0x7f   :  { %742 = vmatpush1.bf16.msra.mxu1 %v1695_v47  ;;  %v116_v31 = vpack.c.bf16 %v109_v26, %v102_v25  ;;  %v1704_v47 = vld [vmem:[#allocation5 + $0x2b0] ss:$8 sps:$4 sm:$0xff]   ;;  %v1755_v6 = vld [vmem:[#allocation7 + $0x78] sm:$0xff]  }
  0x80   :  { %743 = vmatprep.subr.bf16.mxu1 %v1696_v48  ;;  %v1712_v48 = vld [vmem:[#allocation5 + $0x2c4] ss:$8 sps:$4 sm:$0xff]  }
  0x81   :  { %789 = vmatpush1.bf16.msra.mxu0 %v1623_v29  ;;  %v1682_v29 = vld [vmem:[#allocation5 + $0x274] ss:$8 sps:$4 sm:$0xff]  }
  0x82   :  { %790 = vmatprep.subr.bf16.mxu0 %v1624_v30  ;;  %v1742_v30 = vld [vmem:[#allocation7] sm:$0xff]  }
  0x83   :  { %744 = vmatpush1.bf16.msra.mxu1 %v1701_v51  ;;  %v1716_v51 = vld [vmem:[#allocation5 + $0x2d0] ss:$8 sps:$4 sm:$0xff]  }
  0x84   :  { %745 = vmatprep.subr.bf16.mxu1 %v1702_v52  ;;  %v1724_v52 = vld [vmem:[#allocation5 + $0x2e4] ss:$8 sps:$4 sm:$0xff]  }
  0x85   :  { %791 = vmatpush1.bf16.msra.mxu0 %v1626_v33  ;;  %v1680_v33 = vld [vmem:[#allocation5 + $0x270] ss:$8 sps:$4 sm:$0xff]  }
  0x86   :  { %792 = vmatprep.subr.bf16.mxu0 %v1627_v34  ;;  %v1688_v34 = vld [vmem:[#allocation5 + $0x284] ss:$8 sps:$4 sm:$0xff]  }
  0x87   :  { %746 = vmatpush1.bf16.msra.mxu1 %v1707_v57  ;;  %v113_v57 = vld [vmem:[#allocation2 + $0x58] sm:$0xff] }
  0x88   :  { %747 = vmatprep.subr.bf16.mxu1 %v1708_v60  ;;  %v1734_v60 = vld [vmem:[#allocation5 + $0x300] ss:$8 sps:$4 sm:$0xff]  }
  0x89   :  { %793 = vmatpush1.bf16.msra.mxu0 %v1629_v37  ;;  %v1686_v37 = vld [vmem:[#allocation5 + $0x280] ss:$8 sps:$4 sm:$0xff]  }
  0x8a   :  { %794 = vmatprep.subr.bf16.mxu0 %v1630_v38  ;;  %v1694_v38 = vld [vmem:[#allocation5 + $0x294] ss:$8 sps:$4 sm:$0xff]  }
  0x8b   :  { %748 = vmatpush1.bf16.msra.mxu1 %v1713_v1  ;;  %v1750_v1 = vld [vmem:[#allocation7 + $0x20] sm:$0xff]  }
  0x8c   :  { %749 = vmatprep.subr.bf16.mxu1 %v1714_v2  ;;  %v1751_v2 = vld [vmem:[#allocation7 + $0x68] sm:$0xff]  }
  0x8d   :  { %795 = vmatpush1.bf16.msra.mxu0 %v1632_v41  ;;  %v1692_v41 = vld [vmem:[#allocation5 + $0x290] ss:$8 sps:$4 sm:$0xff]  }
  0x8e   :  { %796 = vmatprep.subr.bf16.mxu0 %v1633_v42  ;;  %v1700_v42 = vld [vmem:[#allocation5 + $0x2a4] ss:$8 sps:$4 sm:$0xff]  }
  0x8f   :  { %750 = vmatpush1.bf16.msra.mxu1 %v1719_v7  ;;  %v1756_v7 = vld [vmem:[#allocation7 + $0x38] sm:$0xff]  }
  0x90   :  { %751 = vmatprep.subr.bf16.mxu1 %v1720_v9 }
  0x91   :  { %797 = vmatpush1.bf16.msra.mxu0 %v1635_v45  ;;  %v1698_v45 = vld [vmem:[#allocation5 + $0x2a0] ss:$8 sps:$4 sm:$0xff]  }
  0x92   :  { %798 = vmatprep.subr.bf16.mxu0 %v1636_v46  ;;  %v1706_v46 = vld [vmem:[#allocation5 + $0x2b4] ss:$8 sps:$4 sm:$0xff]  }
  0x93   :  { %752 = vmatpush1.bf16.msra.mxu1 %v1725_v12 }
  0x94   :  { %753 = vmatprep.subr.bf16.mxu1 %v1726_v13  ;;  %v223_v13 = vlaneseq }
  0x95   :  { %799 = vmatpush1.bf16.msra.mxu0 %v1638_v49  ;;  %v1710_v49 = vld [vmem:[#allocation5 + $0x2c0] ss:$8 sps:$4 sm:$0xff]  }
  0x96   :  { %800 = vmatprep.subr.bf16.mxu0 %v1639_v50  ;;  %v1718_v50 = vld [vmem:[#allocation5 + $0x2d4] ss:$8 sps:$4 sm:$0xff]  }
  0x97   :  { %754 = vmatpush1.bf16.msra.mxu1 %v1731_v17 }
  0x98   :  { %755 = vmatprep.subr.bf16.mxu1 %v1732_v19 }
  0x99   :  { %801 = vmatpush1.bf16.msra.mxu0 %v1641_v53  ;;  %v1722_v53 = vld [vmem:[#allocation5 + $0x2e0] ss:$8 sps:$4 sm:$0xff]  }
  0x9a   :  { %813 = vmatprep.subr.bf16.mxu0 %v1644_v56  ;;  %v106_v56 = vld [vmem:[#allocation2 + $0x20] sm:$0xff] }
  0x9b   :  { %756 = vmatpush1.bf16.msra.mxu1 %v1737_v20 }
  0x9c   :  { %803 = vmatmul.mubr.bf16.vlgmr.msra.gmra.mrb[0].mxu0 %v118_v59  ;;  %757 = vmatprep.subr.bf16.mxu1 %v1738_v21  ;;  %v120_v59 = vpack.c.bf16 %v113_v57, %v106_v56  ;;  %v1765_v57 = vld [vmem:[#allocation10] sm:$0xff]  }
  0x9d   :  { %814 = vmatpush1.bf16.msra.mxu0 %v1642_v58  ;;  %845 = vmatprep.mubr.bf16.mxu0 %v121_v0  ;;  %v1736_v58 = vld [vmem:[#allocation5 + $0x304] ss:$8 sps:$4 sm:$0xff]  }
  0x9e   :  { %815 = vmatprep.subr.bf16.mxu0 %v1647_v63  ;;  %v115_v63 = vld [vmem:[#allocation2 + $0x68] sm:$0xff] }
  0x9f   :  { %758 = vmatpush1.bf16.msra.mxu1 %v1740_v24  ;;  %v122_v0 = vpack.c.bf16 %v115_v63, %v108_v62  ;;  %v1769_v62 = vld [vmem:[#allocation10 + $0x20] sm:$0xff]   ;;  %v1770_v63 = vld [vmem:[#allocation10 + $0x28] sm:$0xff]  }
  0xa0   :  { %1483 = vmatprep.subr.bf16.mxu1 %v1741_v27 }
  0xa1   :  { %816 = vmatpush1.bf16.msra.mxu0 %v1645_v3  ;;  %v1752_v3 = vld [vmem:[#allocation7 + $0x28] sm:$0xff]  }
  0xa2   :  { %817 = vmatprep.subr.bf16.mxu0 %v1652_v4  ;;  %760 = vmatmul.mubr.bf16.vlgmr.msra.gmra.mrb[0].mxu1 %v116_v31  ;;  %v1753_v4 = vld [vmem:[#allocation7 + $0x70] sm:$0xff]  }
  0xa3   :  { %1484 = vmatpush3.bf16.msra.mxu1 %v1742_v30 }
  0xa4   :  { %1485 = vmatprep.subr.bf16.mxu1 %v1743_v32 }
  0xa5   :  { %818 = vmatpush1.bf16.msra.mxu0 %v1650_v10 }
  0xa6   :  { %819 = vmatprep.subr.bf16.mxu0 %v1658_v11 }
  0xa7   :  { %1486 = vmatpush3.bf16.msra.mxu1 %v1744_v35 }
  0xa8   :  { %1487 = vmatprep.subr.bf16.mxu1 %v1745_v36 }
  0xa9   :  { %820 = vmatpush1.bf16.msra.mxu0 %v1656_v14  ;;  %v224_v14 = vshrl.u32 %v223_v13, 7 }
  0xaa   :  { %821 = vmatprep.subr.bf16.mxu0 %v1664_v15 }
  0xab   :  { %1488 = vmatpush3.bf16.msra.mxu1 %v1746_v39  ;;  %v225_v15 = vsub.s32 0, %v224_v14  ;;  %v229_v17 = vsub.s32 1, %v224_v14  ;;  %v1758_v39 = vld [vmem:[#allocation8 + $0x8] sm:$0xff]  }
  0xac   :  { %1489 = vmatprep.subr.bf16.mxu1 %v1747_v40  ;;  %v1759_v40 = vld [vmem:[#allocation8 + $0x10] sm:$0xff]  }
  0xad   :  { %822 = vmatpush1.bf16.msra.mxu0 %v1662_v16  ;;  %v221_v16 = vld [vmem:[%s2096_s2] sm:$0x3] }
  0xae   :  { %823 = vmatprep.subr.bf16.mxu0 %v1670_v18  ;;  %v226_v18 = vrot.slane %v221_v16, %v225_v15  ;;  %v230_v19 = vrot.slane %v221_v16, %v229_v17 }
  0xaf   :  { %1490 = vmatpush3.bf16.msra.mxu1 %v1748_v43  ;;  %v1762_v43 = vld [vmem:[#allocation8 + $0x28] sm:$0xff]  }
  0xb0   :  { %1491 = vmatprep.subr.bf16.mxu1 %v1749_v44  ;;  %v1763_v44 = vld [vmem:[#allocation8 + $0x30] sm:$0xff]  }
  0xb1   :  { %824 = vmatpush1.bf16.msra.mxu0 %v1668_v22 }
  0xb2   :  { %825 = vmatprep.subr.bf16.mxu0 %v1676_v23 }
  0xb3   :  { %1492 = vmatpush3.bf16.msra.mxu1 %v1750_v1  ;;  %v1772_v1 = vld [vmem:[#allocation10 + $0x38] sm:$0xff]  }
  0xb4   :  { %1493 = vmatprep.subr.bf16.mxu1 %v1751_v2  ;;  %v1456_v2 = vld [vmem:[%s2100_s6] ss:$0 sm:$0xff]  ;;  %s1883_s6 = scalar_lea.vmem %s1327_s16, 128 }
  0xb5   :  { %826 = vmatpush1.bf16.msra.mxu0 %v1674_v28  ;;  %p1884_p12 = scmp.ne.s32.totalorder %s1327_s16, %s1883_s6  ;;  %p1889_p0 = scmp.lt.s32.totalorder %s1883_s6, %s1883_s6 }
  0xb6   :  { %827 = vmatprep.subr.bf16.mxu0 %v1682_v29 }
  0xb7   :  { %1494 = vmatpush3.bf16.msra.mxu1 %v1752_v3  ;;  %p1890_p1 = por %p1889_p0, %p1888_p13 }
  0xb8   :  { %1495 = vmatprep.subr.bf16.mxu1 %v1753_v4 }
  0xb9   :  { %828 = vmatpush1.bf16.msra.mxu0 %v1680_v33  ;;  %p1891_p2 = pnand %p1890_p1, %p1884_p12 }
  0xba   :  { %829 = vmatprep.subr.bf16.mxu0 %v1688_v34 }
  0xbb   :  { %1496 = vmatpush3.bf16.msra.mxu1 %v1754_v5 }
  0xbc   :  { %1497 = vmatprep.subr.bf16.mxu1 %v1755_v6 }
  0xbd   :  { %830 = vmatpush1.bf16.msra.mxu0 %v1686_v37 }
  0xbe   :  { %831 = vmatprep.subr.bf16.mxu0 %v1694_v38  ;;  %v1757_v38 = vld [vmem:[#allocation8] sm:$0xff]  }
  0xbf   :  { %1498 = vmatpush3.bf16.msra.mxu1 %v1756_v7 }
  0xc0   :  { %1523 = vmatprep.subr.bf16.mxu1 %v1925_v8 }
  0xc1   :  { %832 = vmatpush1.bf16.msra.mxu0 %v1692_v41  ;;  %v1760_v41 = vld [vmem:[#allocation8 + $0x18] sm:$0xff]  }
  0xc2   :  { %833 = vmatprep.subr.bf16.mxu0 %v1700_v42  ;;  %v1761_v42 = vld [vmem:[#allocation8 + $0x20] sm:$0xff]  }
  0xc5   :  { %834 = vmatpush1.bf16.msra.mxu0 %v1698_v45  ;;  %v1764_v45 = vld [vmem:[#allocation8 + $0x38] sm:$0xff]  }
  0xc6   :  { %835 = vmatprep.subr.bf16.mxu0 %v1706_v46 }
  0xc9   :  { %836 = vmatpush1.bf16.msra.mxu0 %v1704_v47  ;;  %v1439_v47 = vld [vmem:[%s2098_s4] ss:$0 sm:$0xff] }
  0xca   :  { %837 = vmatprep.subr.bf16.mxu0 %v1712_v48 }
  0xcd   :  { %838 = vmatpush1.bf16.msra.mxu0 %v1710_v49 }
  0xce   :  { %839 = vmatprep.subr.bf16.mxu0 %v1718_v50 }
  0xd1   :  { %840 = vmatpush1.bf16.msra.mxu0 %v1716_v51 }
  0xd2   :  { %841 = vmatprep.subr.bf16.mxu0 %v1724_v52 }
  0xd5   :  { %842 = vmatpush1.bf16.msra.mxu0 %v1722_v53 }
  0xd6   :  { %843 = vmatprep.subr.bf16.mxu0 %v1730_v54 }
  0xd9   :  { %844 = vmatpush1.bf16.msra.mxu0 %v1728_v55 }
  0xda   :  { %856 = vmatprep.subr.bf16.mxu0 %v1736_v58 }
  0xdc   :  { %846 = vmatmul.mubr.bf16.vlgmr.msra.gmra.mrb[0].mxu0 %v120_v59  ;;  %v1766_v59 = vld [vmem:[#allocation10 + $0x8] sm:$0xff]  }
  0xdd   :  { %857 = vmatpush1.bf16.msra.mxu0 %v1734_v60  ;;  %888 = vmatprep.mubr.bf16.mxu0 %v1924_v61  ;;  %v1767_v60 = vld [vmem:[#allocation10 + $0x10] sm:$0xff]   ;;  %v1768_v61 = vld [vmem:[#allocation10 + $0x18] sm:$0xff]  }
  0xe8   :  { %1438 = vmatmul.mubr.msk.bf16.vlgmr.msra.gmra.mrb[0].mxu0 %vm723_vm0, %v122_v0  ;;  %v1771_v0 = vld [vmem:[#allocation10 + $0x30] sm:$0xff]  }
 0x175   :  { %v761_v9 = vpop.f32.mrb[0].mxu1 }
 0x176   :  { %v763_v10 = vpop.f32.mrb[1].mxu1  ;;  %v762_v20 = vadd.f32 %v761_v9, %v226_v18 }
 0x177   :  { %v765_v11 = vpop.f32.mrb[2].mxu1  ;;  %v764_v21 = vadd.f32 %v763_v10, %v230_v19 }
 0x178   :  { %v767_v12 = vpop.f32.mrb[3].mxu1  ;;  %v766_v23 = vadd.f32 %v765_v11, %v226_v18 }
 0x179   :  { %v768_v26 = vadd.f32 %v767_v12, %v230_v19 }
 0x1bb   :  { %v890_v22 = vpop.f32.mrb[0].mxu0 }
 0x1bc   :  { %v1564_v24 = vadd.f32 %v890_v22, %v762_v20  ;;  %v892_v25 = vpop.f32.mrb[1].mxu0 }
 0x1bd   :  { %v1566_v27 = vadd.f32 %v892_v25, %v764_v21  ;;  %v894_v28 = vpop.f32.mrb[2].mxu0 }
 0x1be   :  { %v1568_v29 = vadd.f32 %v894_v28, %v766_v23  ;;  %v896_v30 = vpop.f32.mrb[3].mxu0  ;;  %v899_v32 = vmax.f32 %v1564_v24, 0.0 }
 0x1bf   :  { %v1570_v31 = vadd.f32 %v896_v30, %v768_v26  ;;  %v900_v34 = vmax.f32 %v1566_v27, 0.0 }
 0x1c0   :  { %v901_v33 = vmax.f32 %v1568_v29, 0.0 }
 0x1c1   :  { %v902_v35 = vmax.f32 %v1570_v31, 0.0 }
 0x1c2   :  { %v903_v36 = vpack.c.bf16 %v901_v33, %v899_v32 }
 0x1c3   :  { %v904_v37 = vpack.c.bf16 %v902_v35, %v900_v34 }
 0x1c5   :  { %1072 = vmatprep.mubr.bf16.mxu1 %v904_v37 }
 0x1c6   :  { %1073 = vmatmul.mubr.bf16.vlgmr.msra.gmra.mrb[4].mxu1 %v903_v36 }
 0x1c7   :  { %1524 = vmatpush3.bf16.msra.mxu1 %v1757_v38  ;;  %1539 = vmatprep.mubr.msk.bf16.mxu1 %vm1926_vm1, %v1925_v8 }
 0x1c8   :  { %1525 = vmatprep.subr.bf16.mxu1 %v1925_v8 }
 0x1cb   :  { %1526 = vmatpush3.bf16.msra.mxu1 %v1758_v39 }
 0x1cc   :  { %1527 = vmatprep.subr.bf16.mxu1 %v1925_v8 }
 0x1cf   :  { %1528 = vmatpush3.bf16.msra.mxu1 %v1759_v40 }
 0x1d0   :  { %1529 = vmatprep.subr.bf16.mxu1 %v1925_v8 }
 0x1d3   :  { %1530 = vmatpush3.bf16.msra.mxu1 %v1760_v41 }
 0x1d4   :  { %1531 = vmatprep.subr.bf16.mxu1 %v1925_v8 }
 0x1d7   :  { %1532 = vmatpush3.bf16.msra.mxu1 %v1761_v42 }
 0x1d8   :  { %1533 = vmatprep.subr.bf16.mxu1 %v1925_v8 }
 0x1db   :  { %1534 = vmatpush3.bf16.msra.mxu1 %v1762_v43 }
 0x1dc   :  { %1535 = vmatprep.subr.bf16.mxu1 %v1925_v8 }
 0x1df   :  { %1536 = vmatpush3.bf16.msra.mxu1 %v1763_v44 }
 0x1e0   :  { %1537 = vmatprep.subr.bf16.mxu1 %v1925_v8 }
 0x1e3   :  { %1538 = vmatpush3.bf16.msra.mxu1 %v1764_v45 }
 0x1e4   :  { %1543 = vmatprep.subr.bf16.mxu1 %v1925_v8 }
 0x299   :  { %v1499_v46 = vpop.f32.mrb[4].mxu1 }
 0x29a   :  { %v1500_v48 = vpop.f32.mrb[5].mxu1 }
 0x29b   :  { %v1501_v49 = vadd.f32 %v1500_v48, %v1499_v46  ;;  %v1502_v50 = vpop.f32.mrb[6].mxu1 }
 0x29c   :  { %v1503_v51 = vpop.f32.mrb[7].mxu1 }
 0x29d   :  { %v1075_v52 = vadd.f32 %v1501_v49, %v1439_v47  ;;  %v1504_v53 = vadd.f32 %v1503_v51, %v1502_v50 }
 0x29f   :  { %v1078_v54 = vadd.f32 %v1504_v53, %v1439_v47  ;;  %v1081_v55 = vmax.f32 %v1075_v52, 0.0 }
 0x2a1   :  { %v1082_v56 = vmax.f32 %v1078_v54, 0.0 }
 0x2a3   :  { %v1083_v58 = vpack.c.bf16 %v1082_v56, %v1081_v55 }
 0x2a5   :  { %1540 = vmatmul.mubr.bf16.vlgmr.msra.gmra.mrb[8].mxu1 %v1083_v58 }
 0x2a6   :  { %1544 = vmatpush3.bf16.msra.mxu1 %v1765_v57  ;;  %1559 = vmatprep.mubr.msk.bf16.mxu1 %vm1926_vm1, %v1925_v8 }
 0x2a7   :  { %1545 = vmatprep.subr.bf16.mxu1 %v1925_v8 }
 0x2aa   :  { %1546 = vmatpush3.bf16.msra.mxu1 %v1766_v59 }
 0x2ab   :  { %1547 = vmatprep.subr.bf16.mxu1 %v1925_v8 }
 0x2ae   :  { %1548 = vmatpush3.bf16.msra.mxu1 %v1767_v60 }
 0x2af   :  { %1549 = vmatprep.subr.bf16.mxu1 %v1925_v8 }
 0x2b2   :  { %1550 = vmatpush3.bf16.msra.mxu1 %v1768_v61 }
 0x2b3   :  { %1551 = vmatprep.subr.bf16.mxu1 %v1925_v8 }
 0x2b6   :  { %1552 = vmatpush3.bf16.msra.mxu1 %v1769_v62 }
 0x2b7   :  { %1553 = vmatprep.subr.bf16.mxu1 %v1925_v8 }
 0x2ba   :  { %1554 = vmatpush3.bf16.msra.mxu1 %v1770_v63 }
 0x2bb   :  { %1555 = vmatprep.subr.bf16.mxu1 %v1925_v8 }
 0x2be   :  { %1556 = vmatpush3.bf16.msra.mxu1 %v1771_v0 }
 0x2bf   :  { %1557 = vmatprep.subr.bf16.mxu1 %v1925_v8  ;;  %v1465_v8 = vld [vmem:[%s2102_s8] ss:$0 sm:$0xff] }
 0x2c2   :  { %1558 = vmatpush3.bf16.msra.mxu1 %v1772_v1 }
 0x378   :  { %v1189_v3 = vpop.f32.mrb[8].mxu1 }
 0x379   :  { %v1190_v4 = vadd.f32 %v1456_v2, %v1189_v3  ;;  %v1541_v5 = vpop.f32.mrb[9].mxu1 }
 0x37a   :  { %v1192_v6 = vpop.f32.mrb[10].mxu1 }
 0x37b   :  { %v1193_v7 = vadd.f32 %v1456_v2, %v1192_v6  ;;  %v1542_v9 = vpop.f32.mrb[11].mxu1  ;;  %v1196_v10 = vmax.f32 %v1190_v4, 0.0 }
 0x37d   :  { %v1197_v11 = vmax.f32 %v1193_v7, 0.0 }
 0x37f   :  { %v1198_v12 = vpack.c.bf16 %v1197_v11, %v1196_v10 }
 0x381   :  { %1560 = vmatmul.mubr.bf16.vlgmr.msra.gmra.mrb[12].mxu1 %v1198_v12 }
 0x454   :  { %v1304_v13 = vpop.f32.mrb[12].mxu1 }
 0x455   :  { %v1561_v14 = vpop.f32.mrb[13].mxu1  ;;  %v1305_v16 = vadd.f32 %v1465_v8, %v1304_v13 }
 0x456   :  { %v1307_v15 = vpop.f32.mrb[14].mxu1 }
 0x457   :  { %v1308_v17 = vadd.f32 %v1465_v8, %v1307_v15  ;;  %v1562_v18 = vpop.f32.mrb[15].mxu1 }
 0x459   :  { %v1481_v19 = vpack.c.bf16 %v1308_v17, %v1305_v16 }
 0x45b   :  { %1482 = vst [vmem:[#allocation11] sm:$0xff] %v1481_v19  }
 0x45c   :  { %1894 = shalt.err (!%p1891_p2)
}
 0x45d   :  { %s1895_s18 = scalar_lea.hbm %s2103_s9, 128 }
 0x45e   :  { %p1896_p3 = scmp.ne.s32.totalorder %s2103_s9, %s1895_s18  ;;  %p1899_p4 = scmp.lt.u32.totalorder %s1895_s18, %s2103_s9 }
 0x460   :  { %p1901_p5 = pnand %p1899_p4, %p1896_p3 }
 0x462   :  { %1904 = shalt.err (!%p1901_p5)
}
 0x463   :  { %1332 = dma.vmem_to_hbm [thread:$0]  %s1327_s16, 128, %s2103_s9, [#allocation4], %s1918_s10, %s1918_s10, %s1919_s14  }
 0x464   :  { %1911 = dma.done.wait [#allocation4], 128  }
 0x465   :  { %1912 = vsyncadd [#allocation4], 4294967168 }
 0x466   :  { %1336 = vsyncpa [#allocation3], 1 }
 0x467   :  { %1337 = vsyncpa [#allocation6], 1 }
 0x468   :  { %1338 = vsyncpa [#allocation9], 1 }
 0x469   :  { %1339 = vsyncpa [#allocation4], 1 }

</bundles_post_ra>
